<compile_context>
chip_gen: v6e
topology: v6e:2x2x1
jax: 0.10.0
libtpu: 0.0.40
codegen_flags: <defaults>
</compile_context>

<pallas_src>
import functools
import math

import jax
import jax.numpy as jnp
from jax.experimental import pallas as pl
from jax.experimental.pallas import tpu as pltpu


# ---------------------------------------------------------------------------
# Kernels
# ---------------------------------------------------------------------------

def _channel_conv_sigmoid(w_ref, padded, c_len, k):
    """padded: (bt, c_len + 2*pad, 1) f32 pooled means (1/HW folded into weights).
    conv[c] = sum_j w[j] * pooled[c + j - pad]; returns sigmoid(conv) f32."""
    conv = w_ref[0, 0] * padded[:, 0:c_len, :]
    for j in range(1, k):                      # k is static and tiny (3, 5, ...)
        conv = conv + w_ref[0, j] * padded[:, j:j + c_len, :]
    return jax.nn.sigmoid(conv)


def _eca_kernel_full(w_ref, x_ref, o_ref, *, k, pad):
    """Full-channel block.  w_ref: (1, k) SMEM; x_ref/o_ref block: (b_tile, C, HW)."""
    C = x_ref.shape[1]
    # 1) spatial sum (f32 accumulation, no f32 copy of the tile)
    pooled = jnp.sum(x_ref[...], axis=-1, keepdims=True, dtype=jnp.float32)  # (bt, C, 1)
    # 2) zero-pad channel edges + k shifted FMAs
    if pad > 0:
        z = jnp.zeros((pooled.shape[0], pad, 1), jnp.float32)
        padded = jnp.concatenate([z, pooled, z], axis=1)
    else:
        padded = pooled
    scale = _channel_conv_sigmoid(w_ref, padded, C, k).astype(o_ref.dtype)
    # 3) gate in the input dtype (re-index x_ref; short live range)
    o_ref[...] = x_ref[...] * scale


def _eca_kernel_ctile(w_ref, x_ref, x_hbm, o_ref, halo_buf, halo_sem, *, k, pad, c_tile):
    """Channel-tiled block with a +/-pad channel halo fetched via manual DMA.
    x_ref/o_ref block: (1, c_tile, HW); x_hbm: full (B, C, HW) left in HBM."""
    b = pl.program_id(0)
    c = pl.program_id(1)
    last_c = pl.num_programs(1) - 1
    c0 = c * c_tile

    pooled = jnp.sum(x_ref[...], axis=-1, keepdims=True, dtype=jnp.float32)  # (1, c_tile, 1)

    if pad > 0:
        # Left halo: channels [c0 - pad, c0) — only when they exist.
        @pl.when(c > 0)
        def _():
            cp = pltpu.make_async_copy(
                x_hbm.at[b, pl.ds(c0 - pad, pad), :], halo_buf.at[0], halo_sem.at[0])
            cp.start()
            cp.wait()

        # Right halo: channels [c0 + c_tile, c0 + c_tile + pad).
        @pl.when(c < last_c)
        def _():
            cp = pltpu.make_async_copy(
                x_hbm.at[b, pl.ds(c0 + c_tile, pad), :], halo_buf.at[1], halo_sem.at[1])
            cp.start()
            cp.wait()

        lsum = jnp.sum(halo_buf[0], axis=-1, keepdims=True, dtype=jnp.float32)  # (pad, 1)
        rsum = jnp.sum(halo_buf[1], axis=-1, keepdims=True, dtype=jnp.float32)
        lsum = jnp.where(c > 0, lsum, 0.0)        # global channel edge -> zero pad
        rsum = jnp.where(c < last_c, rsum, 0.0)
        padded = jnp.concatenate([lsum[None], pooled, rsum[None]], axis=1)
    else:
        padded = pooled

    scale = _channel_conv_sigmoid(w_ref, padded, c_tile, k).astype(o_ref.dtype)
    o_ref[...] = x_ref[...] * scale


# ---------------------------------------------------------------------------
# Wrapper
# ---------------------------------------------------------------------------

def _largest_divisor_leq(n, cap):
    best = 1
    for d in range(1, n + 1):
        if n % d == 0 and d <= cap:
            best = d
    return best


def _pick_c_tile(C, max_block_bytes, hw_bytes):
    """Largest divisor of C that is a multiple of 8 (sublane constraint) whose
    (c_tile, HW) block fits the budget.  None if no such divisor exists."""
    best = None
    for d in range(8, C, 8):
        if C % d == 0 and d * hw_bytes <= max_block_bytes:
            best = d
    return best


def _tpu_vmem_capacity():
    try:
        return int(pltpu.get_tpu_info().vmem_capacity_bytes)
    except Exception:
        return 64 * 2**20                      # conservative (v7x-sized) fallback


def _is_megacore():
    try:
        kind = jax.devices()[0].device_kind.lower()
        return ("v7" in kind) or ("7x" in kind)
    except Exception:
        return False


def _vmem_limit(vmem_cap, block_bytes):
    # in + out blocks, double-buffered, plus slack for pooled/halo/scratch.
    need = 4 * block_bytes + (6 << 20)
    return int(min(int(0.9 * vmem_cap), max(need, 32 << 20)))


def eca_forward(x, w, k, pad, *, block_budget_bytes=None):
    B, C, H, W = x.shape
    HW = H * W
    # No spatial padding: blocks use the full HW as their last dim, avoiding the
    # extra HBM pad-write and slice-copy passes of the previous version.
    xf = x.reshape(B, C, HW)
    # Fold the 1/HW mean factor into the conv weights (kernel does a pure sum).
    w_scaled = w.reshape(1, -1).astype(jnp.float32) / float(HW)

    vmem_cap = _tpu_vmem_capacity()
    megacore = _is_megacore()

    itemsize = xf.dtype.itemsize
    hw_bytes = HW * itemsize
    bytes_per_batch = C * hw_bytes

    if block_budget_bytes is None:
        # 2x(in) + 2x(out) double-buffered blocks + slack must fit real VMEM.
        block_budget = max(1 << 20, (int(0.85 * vmem_cap) - (4 << 20)) // 4)
    else:
        block_budget = int(block_budget_bytes)

    out_shape = jax.ShapeDtypeStruct((B, C, HW), xf.dtype)

    # Choose between full-channel blocks (batch-tiled) and channel-tiled blocks
    # with a +/-pad halo.
    want_ctile = bytes_per_batch > block_budget
    ctile_budget = block_budget
    if (not want_ctile) and megacore and B == 1 and bytes_per_batch > (2 << 20):
        # Dual-TensorCore chip with batch 1: split channels so both cores work.
        want_ctile = True
        ctile_budget = min(block_budget, bytes_per_batch // 2)

    c_tile = _pick_c_tile(C, ctile_budget, hw_bytes) if want_ctile else None

    if c_tile is not None:
        block_bytes = c_tile * hw_bytes
        out = pl.pallas_call(
            functools.partial(_eca_kernel_ctile, k=k, pad=pad, c_tile=c_tile),
            out_shape=out_shape,
            grid_spec=pltpu.PrefetchScalarGridSpec(
                num_scalar_prefetch=0,
                grid=(B, C // c_tile),
                in_specs=[
                    pl.BlockSpec(memory_space=pltpu.MemorySpace.SMEM),      # weights
                    pl.BlockSpec((1, c_tile, HW), lambda b, c: (b, c, 0)),  # x tile
                    pl.BlockSpec(memory_space=pl.ANY),                      # x in HBM (halo)
                ],
                out_specs=pl.BlockSpec((1, c_tile, HW), lambda b, c: (b, c, 0)),
                scratch_shapes=[
                    pltpu.VMEM((2, max(pad, 1), HW), xf.dtype),
                    pltpu.SemaphoreType.DMA((2,)),
                ],
            ),
            compiler_params=pltpu.CompilerParams(
                dimension_semantics=("parallel", "parallel"),
                vmem_limit_bytes=_vmem_limit(vmem_cap, block_bytes),
            ),
        )(w_scaled, xf, xf)
    else:
        # TODO(synk): two-pass pooled-then-gate fallback for the rare case where a
        # full-channel batch block cannot fit VMEM and C has no multiple-of-8 divisor.
        cap = max(1, block_budget // bytes_per_batch)
        if megacore and B > 1:
            cap = min(cap, max(1, B // 2))     # keep >= 2 grid steps for 2 TCs
        b_tile = _largest_divisor_leq(B, cap)
        block_bytes = b_tile * bytes_per_batch
        out = pl.pallas_call(
            functools.partial(_eca_kernel_full, k=k, pad=pad),
            out_shape=out_shape,
            grid_spec=pltpu.PrefetchScalarGridSpec(
                num_scalar_prefetch=0,
                grid=(B // b_tile,),
                in_specs=[
                    pl.BlockSpec(memory_space=pltpu.MemorySpace.SMEM),      # weights
                    pl.BlockSpec((b_tile, C, HW), lambda b: (b, 0, 0)),     # x block
                ],
                out_specs=pl.BlockSpec((b_tile, C, HW), lambda b: (b, 0, 0)),
            ),
            compiler_params=pltpu.CompilerParams(
                dimension_semantics=("parallel",),
                vmem_limit_bytes=_vmem_limit(vmem_cap, block_bytes),
            ),
        )(w_scaled, xf)

    return out.reshape(B, C, H, W)


# ---------------------------------------------------------------------------
# Reference + test
# ---------------------------------------------------------------------------

def eca_reference(x, w, k, pad):
    """Pure-JAX reference mirroring the PyTorch forward."""
    B, C, H, W = x.shape
    pooled = jnp.mean(x.astype(jnp.float32), axis=(2, 3))             # (B, C)
    padded = jnp.pad(pooled, ((0, 0), (pad, pad)))                    # (B, C + 2*pad)
    wf = w.reshape(-1).astype(jnp.float32)
    conv = jnp.zeros((B, C), jnp.float32)
    for j in range(k):
        conv = conv + wf[j] * padded[:, j:j + C]
    scale = jax.nn.sigmoid(conv)[:, :, None, None]
    return (x * scale.astype(x.dtype)).astype(x.dtype)


def _eca_k_pad(channel, gamma=2, b=1):
    t = int(abs((math.log(channel, 2) + b) / gamma))
    k = t if t % 2 else t + 1
    return k, (k - 1) // 2


if __name__ == "__main__":
    key = jax.random.PRNGKey(0)

    # Case 1: small shape -> full-channel block path.
    B, C, H, W = 2, 8, 16, 16
    k, pad = _eca_k_pad(C)
    kx, kw, key = jax.random.split(key, 3)
    x = jax.random.normal(kx, (B, C, H, W), dtype=jnp.float32)
    bound = 1.0 / math.sqrt(k)
    w = jax.random.uniform(kw, (1, k), dtype=jnp.float32, minval=-bound, maxval=bound)
    out = jax.block_until_ready(eca_forward(x, w, k, pad))
    ref = eca_reference(x, w, k, pad)
    assert out.shape == x.shape and out.dtype == x.dtype
    assert jnp.allclose(out, ref, rtol=1e-5, atol=1e-5), "full-channel path mismatch"

    # Case 2: force the channel-tiled (halo DMA) path with a tiny block budget.
    B2, C2, H2, W2 = 1, 32, 16, 16
    k2, pad2 = _eca_k_pad(C2)
    kx2, kw2, key = jax.random.split(key, 3)
    x2 = jax.random.normal(kx2, (B2, C2, H2, W2), dtype=jnp.float32)
    bound2 = 1.0 / math.sqrt(k2)
    w2 = jax.random.uniform(kw2, (1, k2), dtype=jnp.float32, minval=-bound2, maxval=bound2)
    out2 = jax.block_until_ready(
        eca_forward(x2, w2, k2, pad2, block_budget_bytes=8 * 1024))
    ref2 = eca_reference(x2, w2, k2, pad2)
    assert out2.shape == x2.shape and out2.dtype == x2.dtype
    assert jnp.allclose(out2, ref2, rtol=1e-5, atol=1e-5), "channel-tiled path mismatch"

    print("KERNEL_OK")
</pallas_src>

<mosaic_0001>
module attributes {stable_mosaic.version = 11 : i64} {
  func.func @_eca_kernel_full(%arg0: i32, %arg1: memref<1x3xf32, #tpu.memory_space<smem>>, %arg2: memref<2x8x256xf32, #tpu.memory_space<vmem>>, %arg3: memref<2x8x256xf32, #tpu.memory_space<vmem>>) attributes {dimension_semantics = [#tpu.dimension_semantics<parallel>], iteration_bounds = array<i64: 1>, scalar_prefetch = 0 : i64, scratch_operands = 0 : i64, tpu.core_type = #tpu.core_type<tc>, window_params = [{transform_indices = @transform_0, window_bounds = array<i64: 1, 3>}, {transform_indices = @transform_1, window_bounds = array<i64: 2, 8, 256>}, {transform_indices = @transform_2, window_bounds = array<i64: 2, 8, 256>}]} {
    %c0 = arith.constant 0 : index
    %c0_0 = arith.constant 0 : index
    %c0_1 = arith.constant 0 : index
    %0 = vector.load %arg2[%c0, %c0_0, %c0_1] : memref<2x8x256xf32, #tpu.memory_space<vmem>>, vector<2x8x256xf32>
    %cst = arith.constant dense<0.000000e+00> : vector<2x8xf32>
    %1 = vector.multi_reduction <add>, %0, %cst [2] : vector<2x8x256xf32> to vector<2x8xf32>
    %2 = vector.shape_cast %1 : vector<2x8xf32> to vector<2x8x1xf32>
    %cst_2 = arith.constant 0.000000e+00 : f32
    %3 = vector.broadcast %cst_2 : f32 to vector<2x1x1xf32>
    %4 = tpu.concatenate %3, %2, %3 in 1 : vector<2x1x1xf32>, vector<2x8x1xf32>, vector<2x1x1xf32> -> vector<2x10x1xf32>
    %c0_3 = arith.constant 0 : index
    %c0_4 = arith.constant 0 : index
    %5 = memref.load %arg1[%c0_3, %c0_4] : memref<1x3xf32, #tpu.memory_space<smem>>
    %6 = vector.extract_strided_slice %4 {offsets = [0, 0, 0], sizes = [2, 8, 1], strides = [1, 1, 1]} : vector<2x10x1xf32> to vector<2x8x1xf32>
    %7 = vector.broadcast %5 : f32 to vector<2x8x1xf32>
    %8 = arith.mulf %7, %6 : vector<2x8x1xf32>
    %c0_5 = arith.constant 0 : index
    %c1 = arith.constant 1 : index
    %9 = memref.load %arg1[%c0_5, %c1] : memref<1x3xf32, #tpu.memory_space<smem>>
    %10 = vector.extract_strided_slice %4 {offsets = [0, 1, 0], sizes = [2, 8, 1], strides = [1, 1, 1]} : vector<2x10x1xf32> to vector<2x8x1xf32>
    %11 = vector.broadcast %9 : f32 to vector<2x8x1xf32>
    %12 = arith.mulf %11, %10 : vector<2x8x1xf32>
    %13 = arith.addf %8, %12 : vector<2x8x1xf32>
    %c0_6 = arith.constant 0 : index
    %c2 = arith.constant 2 : index
    %14 = memref.load %arg1[%c0_6, %c2] : memref<1x3xf32, #tpu.memory_space<smem>>
    %15 = vector.extract_strided_slice %4 {offsets = [0, 2, 0], sizes = [2, 8, 1], strides = [1, 1, 1]} : vector<2x10x1xf32> to vector<2x8x1xf32>
    %16 = vector.broadcast %14 : f32 to vector<2x8x1xf32>
    %17 = arith.mulf %16, %15 : vector<2x8x1xf32>
    %18 = arith.addf %13, %17 : vector<2x8x1xf32>
    %19 = arith.negf %18 : vector<2x8x1xf32>
    %20 = math.exp %19 : vector<2x8x1xf32>
    %cst_7 = arith.constant 1.000000e+00 : f32
    %21 = vector.broadcast %cst_7 : f32 to vector<2x8x1xf32>
    %22 = arith.addf %21, %20 : vector<2x8x1xf32>
    %23 = arith.divf %21, %22 : vector<2x8x1xf32>
    %c0_8 = arith.constant 0 : index
    %c0_9 = arith.constant 0 : index
    %c0_10 = arith.constant 0 : index
    %24 = vector.load %arg2[%c0_8, %c0_9, %c0_10] : memref<2x8x256xf32, #tpu.memory_space<vmem>>, vector<2x8x256xf32>
    %25 = vector.broadcast %23 : vector<2x8x1xf32> to vector<2x8x256xf32>
    %26 = arith.mulf %24, %25 : vector<2x8x256xf32>
    %c0_11 = arith.constant 0 : index
    %c0_12 = arith.constant 0 : index
    %c0_13 = arith.constant 0 : index
    %27 = vector.load %arg3[%c0_11, %c0_12, %c0_13] : memref<2x8x256xf32, #tpu.memory_space<vmem>>, vector<2x8x256xf32>
    tpu.vector_store %arg3[%c0_11, %c0_12, %c0_13], %26 {strides = array<i32>} : memref<2x8x256xf32, #tpu.memory_space<vmem>>, vector<2x8x256xf32>,
    return
  }
  func.func @transform_0(%arg0: i32) -> (i32, i32) {
    %c0_i32 = arith.constant 0 : i32
    %c0_i32_0 = arith.constant 0 : i32
    %c0_i32_1 = arith.constant 0 : i32
    return %c0_i32, %c0_i32_0 : i32, i32
  }
  func.func @transform_1(%arg0: i32) -> (i32, i32, i32) {
    %c0_i32 = arith.constant 0 : i32
    %c0_i32_0 = arith.constant 0 : i32
    %c0_i32_1 = arith.constant 0 : i32
    return %arg0, %c0_i32, %c0_i32_0 : i32, i32, i32
  }
  func.func @transform_2(%arg0: i32) -> (i32, i32, i32) {
    %c0_i32 = arith.constant 0 : i32
    %c0_i32_0 = arith.constant 0 : i32
    %c0_i32_1 = arith.constant 0 : i32
    return %arg0, %c0_i32, %c0_i32_0 : i32, i32, i32
  }
}

</mosaic_0001>

<bundles_post_ra>
// kernel: tpu_custom_call.1
= control target key start
LH: loop header
LB: loop body
LE: loop exit
PB: predicated region body
PF: predicated region fallthrough
CT: control target
= control target key end

     0   :  { %7 = vsyncpa [#allocation5], 0  ;;  %s289_s0 = inlined_call_operand.hbm [shape: f32[1,3], index: 0, kind: input, shape index: {}]   ;;  %s290_s1 = inlined_call_operand.hbm [shape: f32[2,8,256], index: 1, kind: input, shape index: {}]   ;;  %s291_s2 = inlined_call_operand.hbm [shape: f32[2,8,256], index: 2, kind: output, shape index: {}]  }
   0x1   :  { %8 = vsyncpa [#allocation3], 0 }
   0x2   :  { %9 = vsyncpa [#allocation4], 0  ;;  %s226_s9 = smov [#allocation2]   ;;  %s227_s12 = smov [#allocation6]  }
   0x3   :  { %17 = dma.hbm_to_smem %s289_s0, 16, %s226_s9, [#allocation5]  }
   0x4   :  { %s23_s13 = sshll.u32 %s227_s12, 4  ;;  %s24_s13 = int_to_ptr.vmem [resolvable:$true] %s23_s13 }
   0x5   :  { %s188_s14 = scalar_lea.vmem %s24_s13, 512  ;;  %p193_p1 = scmp.lt.s32.totalorder %s24_s13, %s24_s13 }
   0x6   :  { %p189_p0 = scmp.ne.s32.totalorder %s24_s13, %s188_s14  ;;  %p194_p2 = scmp.lt.s32.totalorder %s188_s14, %s188_s14 }
   0x8   :  { %p195_p3 = por %p194_p2, %p193_p1 }
   0xa   :  { %p196_p4 = pnand %p195_p3, %p189_p0 }
   0xc   :  { %199 = shalt.err (!%p196_p4)
}
   0xd   :  { %s228_s15 = smov 256   ;;  %s229_s16 = smov 16  }
   0xe   :  { %29 = dma.hbm_to_vmem [thread:$0]  %s290_s1, 512, %s24_s13, [#allocation3], %s228_s15, %s228_s15, %s229_s16  }
   0xf   :  { %220 = dma.done.wait [#allocation5], 16  }
  0x10   :  { %221 = vsyncadd [#allocation5], 4294967280 }
  0x11   :  { %222 = dma.done.wait [#allocation3], 512  }
  0x12   :  { %223 = vsyncadd [#allocation3], 4294966784 }
  0x13   :  { %36 = sfence }
  0x14   :  { %v256_v0 = vld [vmem:[#allocation6] sm:$0xff]  ;;  %v258_v1 = vld [vmem:[#allocation6 + $0x8] sm:$0xff]  ;;  %v260_v2 = vld [vmem:[#allocation6 + $0x10] sm:$0xff]  ;;  %v230_v6 = vmov 0   ;;  %s152_s0 = sld [smem:[#allocation2 + $0x1]]  ;;  %vm53_vm0 = vcmask 1040384  }
  0x15   :  { %v41_v3 = vadd.f32 %v258_v1, %v256_v0  ;;  %v264_v4 = vld [vmem:[#allocation6 + $0x18] sm:$0xff]  ;;  %162 = vset.pattern.permute.xlu1 %v230_v6  ;;  %163 = vset.pattern.permute.xlu0 %v230_v6  ;;  %s153_s1 = sld [smem:[#allocation2 + $0x2]]  ;;  %vm72_vm1 = vcmask 1046528   ;;  %vm93_vm2 = vcmask 1045504   ;;  %s231_s20 = smov [#allocation7]  }
  0x16   :  { %v44_v5 = vadd.f32 %v264_v4, %v260_v2  ;;  %s268_s19 = sld [smem:[#allocation2]]  ;;  %s139_s21 = sshll.u32 %s231_s20, 4  ;;  %s140_s21 = int_to_ptr.vmem [resolvable:$true] %s139_s21 }
  0x17   :  { %42 = vadd.xlane.f32.xlu0 %v41_v3  ;;  %s200_s22 = scalar_lea.vmem %s140_s21, 512  ;;  %p205_p6 = scmp.lt.s32.totalorder %s140_s21, %s140_s21 }
  0x18   :  { %p201_p5 = scmp.ne.s32.totalorder %s140_s21, %s200_s22  ;;  %p206_p7 = scmp.lt.s32.totalorder %s200_s22, %s200_s22 }
  0x1a   :  { %v63_v8 = vstv %s152_s0  ;;  %p207_p8 = por %p206_p7, %p205_p6 }
  0x1b   :  { %45 = vadd.xlane.f32.xlu0 %v44_v5  ;;  %v84_v9 = vstv %s153_s1 }
  0x1c   :  { %v59_v13 = vstv %s268_s19  ;;  %p208_p9 = pnand %p207_p8, %p201_p5 }
  0xa0   :  { %v43_v7 = vpop.xlane.xlu0 %42 }
  0xa1   :  { %v49_v10 = vrot.slane %v43_v7, 7 }
  0xa3   :  { %v54_v11 = vsel %vm53_vm0, 0.0, %v49_v10  ;;  %v56_v12 = vsel %vm53_vm0, %v49_v10, 0.0 }
  0xa4   :  { %v64_v14 = vmul.f32 %v63_v8, %v54_v11  ;;  %v65_v15 = vmul.f32 %v63_v8, %v56_v12  ;;  %v85_v16 = vmul.f32 %v84_v9, %v54_v11  ;;  %v46_v17 = vpop.xlane.xlu0 %45  ;;  %v86_v18 = vmul.f32 %v84_v9, %v56_v12 }
  0xa5   :  { %v50_v19 = vrot.slane %v46_v17, 7  ;;  %v60_v23 = vmul.f32 %v59_v13, %v54_v11 }
  0xa6   :  { %v73_v20 = vrot.slane %v64_v14, 1  ;;  %v74_v21 = vrot.slane %v65_v15, 1  ;;  %v94_v22 = vrot.slane %v85_v16, 2  ;;  %v95_v24 = vrot.slane %v86_v18, 2 }
  0xa7   :  { %v55_v25 = vsel %vm53_vm0, 0.0, %v50_v19  ;;  %v57_v26 = vsel %vm53_vm0, %v50_v19, 0.0 }
  0xa8   :  { %v75_v27 = vsel %vm72_vm1, %v73_v20, %v74_v21  ;;  %v66_v28 = vmul.f32 %v63_v8, %v55_v25  ;;  %v67_v29 = vmul.f32 %v63_v8, %v57_v26  ;;  %v87_v31 = vmul.f32 %v84_v9, %v55_v25 }
  0xa9   :  { %v81_v30 = vadd.f32 %v75_v27, %v60_v23  ;;  %v88_v32 = vmul.f32 %v84_v9, %v57_v26  ;;  %v96_v33 = vsel %vm93_vm2, %v94_v22, %v95_v24  ;;  %v61_v37 = vmul.f32 %v59_v13, %v55_v25 }
  0xaa   :  { %v76_v34 = vrot.slane %v66_v28, 1  ;;  %v77_v35 = vrot.slane %v67_v29, 1  ;;  %v97_v38 = vrot.slane %v87_v31, 2 }
  0xab   :  { %v102_v36 = vadd.f32 %v96_v33, %v81_v30  ;;  %v98_v39 = vrot.slane %v88_v32, 2 }
  0xac   :  { %v78_v40 = vsel %vm72_vm1, %v76_v34, %v77_v35 }
  0xad   :  { %v154_v41 = vmul.f32 -1.442695, %v102_v36  ;;  %v82_v42 = vadd.f32 %v78_v40, %v61_v37  ;;  %v99_v43 = vsel %vm93_vm2, %v97_v38, %v98_v39 }
  0xaf   :  { %164 = vpow2.f32 %v154_v41  ;;  %v103_v44 = vadd.f32 %v99_v43, %v82_v42 }
  0xb1   :  { %v155_v45 = vmul.f32 -1.442695, %v103_v44 }
  0xb3   :  { %166 = vpow2.f32 %v155_v45 }
  0xbc   :  { %v165_v46 = vpop.eup %164 }
  0xbd   :  { %v110_v47 = vadd.f32 1.0, %v165_v46 }
  0xbf   :  { %168 = vrcp.f32 %v110_v47 }
  0xc0   :  { %v167_v48 = vpop.eup %166 }
  0xc1   :  { %v111_v49 = vadd.f32 1.0, %v167_v48 }
  0xc3   :  { %170 = vrcp.f32 %v111_v49 }
  0xcc   :  { %v169_v50 = vpop.eup %168 }
  0xcd   :  { %118 = vperm.xlu1 %162, %v169_v50  }
  0xd0   :  { %v171_v51 = vpop.eup %170 }
  0xd1   :  { %123 = vperm.xlu1 %162, %v171_v51  }
 0x148   :  { %v119_v52 = vpop.permute.xlu1 %118 }
 0x149   :  { %v126_v53 = vmul.f32 %v119_v52, %v256_v0  ;;  %v127_v54 = vmul.f32 %v119_v52, %v258_v1 }
 0x14b   :  { %130 = vst [vmem:[#allocation7] sm:$0xff] %v126_v53  ;;  %131 = vst [vmem:[#allocation7 + $0x8] sm:$0xff] %v127_v54 }
 0x14c   :  { %v124_v55 = vpop.permute.xlu1 %123 }
 0x14d   :  { %v128_v56 = vmul.f32 %v124_v55, %v260_v2  ;;  %v129_v57 = vmul.f32 %v124_v55, %v264_v4 }
 0x14f   :  { %132 = vst [vmem:[#allocation7 + $0x10] sm:$0xff] %v128_v56  ;;  %133 = vst [vmem:[#allocation7 + $0x18] sm:$0xff] %v129_v57 }
 0x150   :  { %211 = shalt.err (!%p208_p9)
}
 0x151   :  { %145 = dma.vmem_to_hbm [thread:$0]  %s140_s21, 512, %s291_s2, [#allocation4], %s228_s15, %s228_s15, %s229_s16  }
 0x152   :  { %224 = dma.done.wait [#allocation4], 512  }
 0x153   :  { %225 = vsyncadd [#allocation4], 4294966784 }
 0x154   :  { %149 = vsyncpa [#allocation3], 1 }
 0x155   :  { %150 = vsyncpa [#allocation4], 1 }
 0x156   :  { %151 = vsyncpa [#allocation5], 1 }

</bundles_post_ra>
